<compile_context>
chip_gen: v5e
topology: v5e:2x2
jax: 0.10.0
libtpu: 0.0.40
codegen_flags: <defaults>
</compile_context>

<pallas_src>
import functools

import jax
import jax.numpy as jnp
from jax.experimental import pallas as pl
from jax.experimental.pallas import tpu as pltpu


def _ffn_kernel(x_ref, w1_ref, b1_ref, w2_ref, b2_ref, o_ref, *, precision):
    # x_ref: (tm, D), w1_ref: (D, H), b1_ref: (1, H),
    # w2_ref: (H, D), b2_ref: (1, D), o_ref: (tm, D)
    x = x_ref[...]

    # Linear 1 (f32 MXU accumulation).
    h = jnp.dot(x, w1_ref[...], precision=precision,
                preferred_element_type=jnp.float32) + b1_ref[...]

    # SiLU: h * sigmoid(h).  The logistic goes to the EUP slot, off the VALU.
    h = h * jax.nn.sigmoid(h)

    # Dropout(p=0.0) == identity.

    # Linear 2; recast the activation to the streaming dtype before the MXU.
    # TODO(synk): for very large hidden dims (tm*H*4B near the VMEM budget),
    # split this matmul over H chunks instead of materializing all of h.
    y = jnp.dot(h.astype(x.dtype), w2_ref[...], precision=precision,
                preferred_element_type=jnp.float32) + b2_ref[...]

    # Dropout(p=0.0) == identity.
    o_ref[...] = y.astype(o_ref.dtype)


def _round_up(n, m):
    return ((n + m - 1) // m) * m


def _sublane(dtype):
    # Sublane tile per dtype: f32 -> 8, bf16 -> 16, int8/fp8 -> 32.
    return {4: 8, 2: 16, 1: 32}.get(jnp.dtype(dtype).itemsize, 8)


def _vmem_cap_bytes():
    # ~80% of physical VMEM: v7x (64 MiB/TC) -> ~51 MiB with headroom for
    # compiler scratch, v5e/v6e (128 MiB) -> ~102 MiB.  Fallback is v7x-safe.
    try:
        return int(pltpu.get_tpu_info().vmem_capacity_bytes * 0.8)
    except Exception:
        return 48 << 20


@functools.partial(jax.jit, static_argnames=("tm",))
def feed_forward(x, w1, b1, w2, b2, *, tm=None):
    """x: [..., D]; w1: [D, H]; b1: [H]; w2: [H, D]; b2: [D].

    Weights are stored as (in_features, out_features), i.e. transposed
    nn.Linear weights, so the kernel computes x @ W + b.
    """
    D = x.shape[-1]
    H = w1.shape[1]
    M = 1
    for d in x.shape[:-1]:
        M *= d
    dtype = x.dtype
    sub = _sublane(dtype)

    # Row tile: default 512 (1024 for large M); keep >=4 grid steps so v7x's
    # two TensorCores both get work; round to the dtype sublane tile.
    if tm is None:
        tm = 1024 if M >= 8192 else 512
    tm_cap = max(sub, _round_up(pl.cdiv(M, 4), sub))
    tm_eff = max(sub, min(_round_up(tm, sub), tm_cap))
    grid = (pl.cdiv(M, tm_eff),)

    # Free reshapes only — no padding, no extra HBM pass over the activation.
    x2d = x.reshape(M, D)
    b1r = b1.reshape(1, H)
    b2r = b2.reshape(1, D)

    itemsize = jnp.dtype(dtype).itemsize
    w_itemsize = jnp.dtype(w1.dtype).itemsize

    # Scheduling hint for XLA around the custom call.
    cost = pl.CostEstimate(
        flops=4 * M * D * H,                       # two matmuls
        transcendentals=M * H,                     # exp inside sigmoid
        bytes_accessed=itemsize * 2 * M * D + w_itemsize * (2 * D * H + H + D),
    )

    # VMEM budget: double-buffered x/out row tiles, single-buffered resident
    # weights/biases, f32 intermediates (h + accumulator), 2x margin, capped
    # by the generation-aware limit above.
    tile_bytes = 2 * 2 * tm_eff * D * itemsize
    weight_bytes = (2 * D * H + H + D) * w_itemsize
    interm_bytes = tm_eff * (H + D) * 4
    vmem_limit = int(min(_vmem_cap_bytes(),
                         max(32 << 20,
                             2 * (tile_bytes + weight_bytes + interm_bytes))))

    # PyTorch f32 Linear is true f32: force HIGHEST for f32 inputs; bf16/fp8
    # inputs use the native MXU path (f32 accumulation either way).
    precision = jax.lax.Precision.HIGHEST if dtype == jnp.float32 else None

    def _resident(shape):
        # Grid-invariant operand: fetched once, one VMEM buffer is enough.
        return pl.BlockSpec(shape, lambda i: (0, 0), pipeline_mode=pl.Buffered(1))

    out = pl.pallas_call(
        functools.partial(_ffn_kernel, precision=precision),
        out_shape=jax.ShapeDtypeStruct((M, D), dtype),
        grid_spec=pltpu.PrefetchScalarGridSpec(
            num_scalar_prefetch=0,
            grid=grid,
            in_specs=[
                pl.BlockSpec((tm_eff, D), lambda i: (i, 0)),  # streamed x rows
                _resident((D, H)),                            # w1 (resident)
                _resident((1, H)),                            # b1
                _resident((H, D)),                            # w2 (resident)
                _resident((1, D)),                            # b2
            ],
            out_specs=pl.BlockSpec((tm_eff, D), lambda i: (i, 0)),
        ),
        compiler_params=pltpu.CompilerParams(
            dimension_semantics=("parallel",),
            vmem_limit_bytes=vmem_limit,
        ),
        cost_estimate=cost,
    )(x2d, w1, b1r, w2, b2r)

    return out.reshape(x.shape)


def _reference(x, w1, b1, w2, b2):
    hp = jax.lax.Precision.HIGHEST
    h = jnp.matmul(x, w1, precision=hp) + b1
    h = h * jax.nn.sigmoid(h)
    return jnp.matmul(h, w2, precision=hp) + b2


if __name__ == "__main__":
    # MobileViT block shapes: dim=32, mlp_dim=2*dim, patch_size=(2,2) -> 4
    # patches per group, 16 tokens per patch group, batch 2.
    B, P, N, D = 2, 4, 16, 32
    H = 2 * D

    key = jax.random.PRNGKey(0)
    kx, k1, k2, k3, k4 = jax.random.split(key, 5)

    x = jax.random.normal(kx, (B, P, N, D), dtype=jnp.float32)

    # PyTorch-Linear-style init (uniform in +-1/sqrt(fan_in)), stored as
    # (in_features, out_features).
    bound1 = 1.0 / (D ** 0.5)
    bound2 = 1.0 / (H ** 0.5)
    w1 = jax.random.uniform(k1, (D, H), jnp.float32, -bound1, bound1)
    b1 = jax.random.uniform(k2, (H,), jnp.float32, -bound1, bound1)
    w2 = jax.random.uniform(k3, (H, D), jnp.float32, -bound2, bound2)
    b2 = jax.random.uniform(k4, (D,), jnp.float32, -bound2, bound2)

    out = jax.block_until_ready(feed_forward(x, w1, b1, w2, b2))
    ref = _reference(x, w1, b1, w2, b2)

    assert out.shape == (B, P, N, D)
    assert jnp.allclose(out, ref, atol=1e-4, rtol=1e-4), "mismatch vs reference"

    print("KERNEL_OK")
</pallas_src>

<mosaic_0001>
module attributes {stable_mosaic.version = 11 : i64} {
  func.func @_ffn_kernel(%arg0: i32, %arg1: memref<32x32xf32, #tpu.memory_space<vmem>>, %arg2: memref<32x64xf32, #tpu.memory_space<vmem>>, %arg3: memref<1x64xf32, #tpu.memory_space<vmem>>, %arg4: memref<64x32xf32, #tpu.memory_space<vmem>>, %arg5: memref<1x32xf32, #tpu.memory_space<vmem>>, %arg6: memref<32x32xf32, #tpu.memory_space<vmem>>) attributes {dimension_semantics = [#tpu.dimension_semantics<parallel>], iteration_bounds = array<i64: 4>, scalar_prefetch = 0 : i64, scratch_operands = 0 : i64, tpu.core_type = #tpu.core_type<tc>, window_params = [{transform_indices = @transform_0, window_bounds = array<i64: 32, 32>}, {pipeline_mode = #tpu.pipeline_mode<synchronous>, transform_indices = @transform_1, window_bounds = array<i64: 32, 64>}, {pipeline_mode = #tpu.pipeline_mode<synchronous>, transform_indices = @transform_2, window_bounds = array<i64: 1, 64>}, {pipeline_mode = #tpu.pipeline_mode<synchronous>, transform_indices = @transform_3, window_bounds = array<i64: 64, 32>}, {pipeline_mode = #tpu.pipeline_mode<synchronous>, transform_indices = @transform_4, window_bounds = array<i64: 1, 32>}, {transform_indices = @transform_5, window_bounds = array<i64: 32, 32>}]} {
    %c0 = arith.constant 0 : index
    %c0_0 = arith.constant 0 : index
    %0 = vector.load %arg1[%c0, %c0_0] : memref<32x32xf32, #tpu.memory_space<vmem>>, vector<32x32xf32>
    %c0_1 = arith.constant 0 : index
    %c0_2 = arith.constant 0 : index
    %1 = vector.load %arg2[%c0_1, %c0_2] : memref<32x64xf32, #tpu.memory_space<vmem>>, vector<32x64xf32>
    %cst = arith.constant dense<0.000000e+00> : vector<32x64xf32>
    %2 = tpu.matmul %0, %1, %cst {dimension_numbers = #tpu.dot_dimension_numbers<[1], [0], [0], [1], [0, 0, 1, 1], [], []>, precision = #tpu.contract_precision<fp32>} : vector<32x32xf32>, vector<32x64xf32>, vector<32x64xf32> -> vector<32x64xf32>
    %c0_3 = arith.constant 0 : index
    %c0_4 = arith.constant 0 : index
    %3 = vector.load %arg3[%c0_3, %c0_4] : memref<1x64xf32, #tpu.memory_space<vmem>>, vector<1x64xf32>
    %4 = vector.broadcast %3 : vector<1x64xf32> to vector<32x64xf32>
    %5 = arith.addf %2, %4 : vector<32x64xf32>
    %6 = arith.negf %5 : vector<32x64xf32>
    %7 = math.exp %6 : vector<32x64xf32>
    %cst_5 = arith.constant 1.000000e+00 : f32
    %8 = vector.broadcast %cst_5 : f32 to vector<32x64xf32>
    %9 = arith.addf %8, %7 : vector<32x64xf32>
    %10 = arith.divf %8, %9 : vector<32x64xf32>
    %11 = arith.mulf %5, %10 : vector<32x64xf32>
    %c0_6 = arith.constant 0 : index
    %c0_7 = arith.constant 0 : index
    %12 = vector.load %arg4[%c0_6, %c0_7] : memref<64x32xf32, #tpu.memory_space<vmem>>, vector<64x32xf32>
    %cst_8 = arith.constant dense<0.000000e+00> : vector<32x32xf32>
    %13 = tpu.matmul %11, %12, %cst_8 {dimension_numbers = #tpu.dot_dimension_numbers<[1], [0], [0], [1], [0, 0, 1, 1], [], []>, precision = #tpu.contract_precision<fp32>} : vector<32x64xf32>, vector<64x32xf32>, vector<32x32xf32> -> vector<32x32xf32>
    %c0_9 = arith.constant 0 : index
    %c0_10 = arith.constant 0 : index
    %14 = vector.load %arg5[%c0_9, %c0_10] : memref<1x32xf32, #tpu.memory_space<vmem>>, vector<1x32xf32>
    %15 = vector.broadcast %14 : vector<1x32xf32> to vector<32x32xf32>
    %16 = arith.addf %13, %15 : vector<32x32xf32>
    %c0_11 = arith.constant 0 : index
    %c0_12 = arith.constant 0 : index
    %17 = vector.load %arg6[%c0_11, %c0_12] : memref<32x32xf32, #tpu.memory_space<vmem>>, vector<32x32xf32>
    tpu.vector_store %arg6[%c0_11, %c0_12], %16 {strides = array<i32>} : memref<32x32xf32, #tpu.memory_space<vmem>>, vector<32x32xf32>,
    return
  }
  func.func @transform_0(%arg0: i32) -> (i32, i32) {
    %c0_i32 = arith.constant 0 : i32
    %c0_i32_0 = arith.constant 0 : i32
    return %arg0, %c0_i32 : i32, i32
  }
  func.func @transform_1(%arg0: i32) -> (i32, i32) {
    %c0_i32 = arith.constant 0 : i32
    %c0_i32_0 = arith.constant 0 : i32
    %c0_i32_1 = arith.constant 0 : i32
    return %c0_i32, %c0_i32_0 : i32, i32
  }
  func.func @transform_2(%arg0: i32) -> (i32, i32) {
    %c0_i32 = arith.constant 0 : i32
    %c0_i32_0 = arith.constant 0 : i32
    %c0_i32_1 = arith.constant 0 : i32
    return %c0_i32, %c0_i32_0 : i32, i32
  }
  func.func @transform_3(%arg0: i32) -> (i32, i32) {
    %c0_i32 = arith.constant 0 : i32
    %c0_i32_0 = arith.constant 0 : i32
    %c0_i32_1 = arith.constant 0 : i32
    return %c0_i32, %c0_i32_0 : i32, i32
  }
  func.func @transform_4(%arg0: i32) -> (i32, i32) {
    %c0_i32 = arith.constant 0 : i32
    %c0_i32_0 = arith.constant 0 : i32
    %c0_i32_1 = arith.constant 0 : i32
    return %c0_i32, %c0_i32_0 : i32, i32
  }
  func.func @transform_5(%arg0: i32) -> (i32, i32) {
    %c0_i32 = arith.constant 0 : i32
    %c0_i32_0 = arith.constant 0 : i32
    return %arg0, %c0_i32 : i32, i32
  }
}

</mosaic_0001>

<bundles_post_ra>
// kernel: feed_forward.1
= control target key start
LH: loop header
LB: loop body
LE: loop exit
PB: predicated region body
PF: predicated region fallthrough
CT: control target
= control target key end

     0   :  { %10 = vsyncpa [#allocation3], 0  ;;  %s1667_s0 = inlined_call_operand.hbm [shape: f32[128,32], index: 0, kind: input, shape index: {}]   ;;  %s1668_s1 = inlined_call_operand.vmem [shape: f32[32,64], index: 1, kind: input, shape index: {}]   ;;  %s1669_s2 = inlined_call_operand.vmem [shape: f32[1,64], index: 2, kind: input, shape index: {}]   ;;  %s1670_s3 = inlined_call_operand.vmem [shape: f32[64,32], index: 3, kind: input, shape index: {}]   ;;  %s1671_s4 = inlined_call_operand.vmem [shape: f32[1,32], index: 4, kind: input, shape index: {}]   ;;  %s1672_s5 = inlined_call_operand.hbm [shape: f32[128,32], index: 5, kind: output, shape index: {}]  }
   0x1   :  { %12 = vsyncpa [#allocation3 + $0x1], 0 }
   0x2   :  { %13 = vsyncpa [#allocation4], 0 }
   0x3   :  { %15 = vsyncpa [#allocation4 + $0x1], 0  ;;  %s1298_s18 = smov 0   ;;  %s1300_s19 = smov 0  }
   0x4   :  { %s1302_s20 = smov 0   ;;  %s1304_s21 = smov 0  }
   0x5 LB: > { %s1319_s22 = sadd.s32 4294967295, %s1262_s21   ;;  %s1078_s23 = sadd.s32 4294967294, %s1262_s21   ;;  %s1262_s21 = sphi %s1304_s21, %s1681_s21   ;;  %s1258_s20 = sphi %s1302_s20, %s1680_s20   ;;  %s1254_s19 = sphi %s1300_s19, %s1679_s19   ;;  %s1250_s18 = sphi %s1298_s18, %s1678_s18  }
   0x6   : > { %s1323_s24 = sadd.s32 1, %s1262_s21   ;;  %s28_s25 = sadd.s32 1, %s1258_s20 }
   0x7   : > { %s25_s26 = ssub.s32 %s1262_s21, %s1323_s24  ;;  %p35_p0 = scmp.ne.s32.totalorder %s1258_s20, %s1254_s19 }
   0x8   : > { %p26_p1 = scmp.eq.s32.totalorder %s25_s26, 0  ;;  %p36_p2 = scmp.eq.s32.totalorder %s1262_s21, 0 }
   0x9   : > { %p41_p3 = scmp.ne.s32.totalorder %s1254_s19, %s1250_s18  ;;  %p42_p4 = scmp.eq.s32.totalorder %s1319_s22, 0 }
   0xa   : > { %s1335_s27 = scalar_select %p26_p1, %s1258_s20, %s28_s25  }
   0xb   : > { %p1337_p5 = por %p36_p2, %p35_p0  ;;  %p1341_p6 = por %p42_p4, %p41_p3 }
   0xc   : > { %p149_p7 = scmp.eq.s32.totalorder %s1319_s22, 3  ;;  %p155_p8 = scmp.eq.s32.totalorder %s1078_s23, 3 }
   0xd   : > { %p1110_p9 = scmp.lt.s32.totalorder %s1262_s21, 4  ;;  %s187_s7 = sand.u32 1, %s1258_s20  }
   0xe   : > { %p1347_p10 = por %p149_p7, %p35_p0  ;;  %p1351_p11 = por %p155_p8, %p41_p3 }
   0xf   : > { %s1096_s8 = sshll.u32 %s1262_s21, 5  ;;  %s1081_s9 = sshll.u32 %s187_s7, 5 }
  0x10   : > { %s196_s12 = scalar_lea.hbm %s1667_s0, %s1096_s8  ;;  %s191_s14 = scalar_lea.vmem [#allocation2], %s1081_s9 }
  0x11   : > { %s197_s13 = sshll.u32 %s196_s12, 4  ;;  %s199_s15 = sshll.u32 %s191_s14, 4  ;;  %s198_s13 = int_to_ptr.hbm [resolvable:$true] %s197_s13  ;;  %s200_s15 = int_to_ptr.vmem [resolvable:$true] %s199_s15 }
  0x12   : > { %p1362_p12 = pnand %p1110_p9, %p1337_p5  ;;  %p1084_p13 = scmp.ge.s32.totalorder %s1262_s21, 1 }
  0x13   : > { %p207_p0 = scmp.lt.s32.totalorder %s1262_s21, 5  ;;  %s188_s17 = scalar_lea.sflag [#allocation3], %s187_s7 }
  0x14   : > { %s1166_s23 = sshra.s32 %s198_s13, 4  ;;  %p1170_p2 = pneg %p1362_p12  ;;  %s1167_s23 = int_to_ptr.hbm [resolvable:$true] %s1166_s23 }
  0x15   : > { %s1168_s25 = scalar_lea.hbm %s1167_s23, 32  ;;  %s1173_s28 = scalar_lea.hbm %s1667_s0, 128 }
  0x16   : > { %p1169_p1 = scmp.ne.s32.totalorder %s1167_s23, %s1168_s25  ;;  %p1174_p5 = scmp.lt.s32.totalorder %s1167_s23, %s1667_s0 }
  0x17   : > { %p1175_p7 = scmp.lt.s32.totalorder %s1173_s28, %s1168_s25 }
  0x18   : > { %p1171_p3 = pnand %p1170_p2, %p1169_p1 }
  0x19   : > { %p1176_p8 = por %p1175_p7, %p1174_p5 }
  0x1a   : > { %p1172_p4 = pneg %p1171_p3 }
  0x1c   : > { %p1177_p9 = pnand %p1176_p8, %p1172_p4 }
  0x1e   : > { %1180 = shalt.err (!%p1177_p9)
}
  0x1f   : > { %s1264_s7 = smov 128   ;;  %s1265_s11 = smov 8  }
  0x20   : > { %1105 = dma.hbm_to_vmem [thread:$0]  (!%p1362_p12), %s198_s13, 512, %s200_s15, %s188_s17, %s1264_s7, %s1264_s7, %s1265_s11  }
  0x21   : > { %p208_p1 = pnand %p1084_p13, %p207_p0 }
  0x22   : > { %s1383_s12 = sand.u32 (!%p208_p1), 1, %s1254_s19  }
  0x23   : > { %211 = sbr.rel (%p208_p1) target bundleno = 456 (0x1c8), region = 40  ;;  %s1085_s14 = sshll.u32 (!%p208_p1), %s1383_s12, 5 }
  0x24   : > { %s214_s23 = scalar_lea.sflag (!%p208_p1), [#allocation3], %s1383_s12  ;;  %s1389_s25 = scalar_lea.vmem (!%p208_p1), [#allocation2], %s1085_s14 }
  0x28   : > { %1241 = dma.done.wait (%p1341_p6), %s214_s23, 512  }
  0x29   : > { %1243 = vsyncadd (%p1341_p6), %s214_s23, 4294966784  ;;  %vm259_vm0 = vcmask 261120   ;;  %v254_v0 = vld [vmem:[%s1668_s1 + $0x18] sm:$0xff]  ;;  %v253_v1 = vld [vmem:[%s1668_s1 + $0x10] sm:$0xff]  ;;  %vm642_vm5 = vcmask 523264   ;;  %s1624_s13 = scalar_lea.vmem [#allocation5], %s1085_s14 }
  0x2a   : > { %v252_v2 = vld [vmem:[%s1668_s1 + $0x8] sm:$0xff]  ;;  %v1404_v3 = vand.u32 4294901760, %v254_v0  ;;  %v1406_v4 = vand.u32 4294901760, %v253_v1  ;;  %v251_v6 = vld [vmem:[%s1668_s1] sm:$0xff]  ;;  %v249_v12 = vld [vmem:[%s1389_s25 + $0x10] sm:$0xff]  ;;  %s1097_s14 = sshll.u32 %s1319_s22, 5 }
  0x2b   : > { %v1408_v5 = vand.u32 4294901760, %v252_v2  ;;  %v247_v7 = vld [vmem:[%s1389_s25] sm:$0xff]  ;;  %v248_v8 = vld [vmem:[%s1389_s25 + $0x8] sm:$0xff]  ;;  %v1415_v9 = vand.u32 4294901760, %v251_v6  ;;  %v267_v19 = vsel %vm259_vm0, %v249_v12, 0  ;;  %v250_v38 = vld [vmem:[%s1389_s25 + $0x18] sm:$0xff]  ;;  %s1001_s17 = scalar_lea.hbm %s1672_s5, %s1097_s14 }
  0x2c   : > { %v261_v10 = vsel %vm259_vm0, %v247_v7, 0  ;;  %v264_v11 = vsel %vm259_vm0, %v248_v8, 0  ;;  %285 = vmatpush.msra.mxu0 %v1404_v3  ;;  %v338_v13 = vsub.f32 %v254_v0, %v1404_v3  ;;  %v344_v14 = vsub.f32 %v253_v1, %v1406_v4  ;;  %436 = vmatpush.msra.mxu3 %v1404_v3  ;;  %v637_v57 = vld [vmem:[%s1670_s3 + $0x38] sm:$0xff]  ;;  %v1463_v59 = vld [vmem:[%s1669_s2] ss:$0 sm:$0xff]  ;;  %v636_v60 = vld [vmem:[%s1670_s3 + $0x30] sm:$0xff] }
  0x2d   : > { %v350_v15 = vsub.f32 %v252_v2, %v1408_v5  ;;  %v1425_v16 = vand.u32 4294901760, %v261_v10  ;;  %v356_v17 = vsub.f32 %v251_v6, %v1415_v9  ;;  %v1428_v18 = vand.u32 4294901760, %v264_v11  ;;  %v635_v63 = vld [vmem:[%s1670_s3 + $0x28] sm:$0xff]  ;;  %v634_v6 = vld [vmem:[%s1670_s3 + $0x20] sm:$0xff]  ;;  %v633_v12 = vld [vmem:[%s1670_s3 + $0x18] sm:$0xff]  ;;  %s1002_s26 = sshll.u32 %s1624_s13, 4  ;;  %s1003_s26 = int_to_ptr.vmem [resolvable:$true] %s1002_s26 }
  0x2e   : > { %287 = vmatpush.msra.mxu0 %v1406_v4  ;;  %392 = vmatpush.msra.mxu2 %v338_v13  ;;  %v339_v20 = vand.u32 4294901760, %v338_v13  ;;  %v345_v22 = vand.u32 4294901760, %v344_v14  ;;  %v308_v31 = vand.u32 4294901760, %v267_v19  ;;  %v270_v42 = vsel %vm259_vm0, %v250_v38, 0  ;;  %s1004_s8 = sshll.u32 %s1001_s17, 4  ;;  %s990_s22 = scalar_lea.sflag [#allocation4], %s1383_s12  ;;  %s1005_s8 = int_to_ptr.hbm [resolvable:$true] %s1004_s8 }
  0x2f   : > { %v293_v21 = vsub.f32 %v261_v10, %v1425_v16  ;;  %v351_v23 = vand.u32 4294901760, %v350_v15  ;;  %438 = vmatpush.msra.mxu3 %v1406_v4  ;;  %v357_v24 = vand.u32 4294901760, %v356_v17  ;;  %v301_v25 = vsub.f32 %v264_v11, %v1428_v18  ;;  %s1210_s29 = sshra.s32 %s1005_s8, 4  ;;  %s1216_s7 = scalar_lea.hbm %s1672_s5, 128  ;;  %s1211_s29 = int_to_ptr.hbm [resolvable:$true] %s1210_s29 }
  0x30   : > { %289 = vmatpush.msra.mxu0 %v1408_v5  ;;  %395 = vmatpush.msra.mxu2 %v344_v14  ;;  %v340_v26 = vsub.f32 %v338_v13, %v339_v20  ;;  %v346_v28 = vsub.f32 %v344_v14, %v345_v22  ;;  %v309_v41 = vsub.f32 %v267_v19, %v308_v31  ;;  %v316_v45 = vand.u32 4294901760, %v270_v42  ;;  %s1212_s28 = scalar_lea.hbm %s1211_s29, 32  ;;  %p1217_p0 = scmp.lt.s32.totalorder %s1211_s29, %s1672_s5 }
  0x31   : > { %v294_v27 = vand.u32 4294901760, %v293_v21  ;;  %v352_v29 = vsub.f32 %v350_v15, %v351_v23  ;;  %440 = vmatpush.msra.mxu3 %v1408_v5  ;;  %v358_v30 = vsub.f32 %v356_v17, %v357_v24  ;;  %v302_v35 = vand.u32 4294901760, %v301_v25  ;;  %p1213_p6 = scmp.ne.s32.totalorder %s1211_s29, %s1212_s28  ;;  %p1218_p2 = scmp.lt.s32.totalorder %s1216_s7, %s1212_s28 }
  0x32   : > { %291 = vmatpush.msra.mxu0 %v1415_v9  ;;  %v341_v32 = vand.u32 4294901760, %v340_v26  ;;  %398 = vmatpush.msra.mxu2 %v350_v15  ;;  %v347_v34 = vand.u32 4294901760, %v346_v28  ;;  %v310_v44 = vand.u32 4294901760, %v309_v41  ;;  %v317_v47 = vsub.f32 %v270_v42, %v316_v45  ;;  %v631_v26 = vld [vmem:[%s1670_s3 + $0x8] sm:$0xff] }
  0x33   : > { %v295_v33 = vsub.f32 %v293_v21, %v294_v27  ;;  %442 = vmatpush.msra.mxu3 %v1415_v9  ;;  %v353_v37 = vand.u32 4294901760, %v352_v29  ;;  %v359_v39 = vand.u32 4294901760, %v358_v30  ;;  %v303_v40 = vsub.f32 %v301_v25, %v302_v35  ;;  %p1214_p12 = pnand %p1213_p6, %p1347_p10  ;;  %p1219_p3 = por %p1218_p2, %p1217_p0 }
  0x34   : > { %483 = vmatpush.msrb.mxu0 %v339_v20  ;;  %342 = vmatpush.msra.mxu1 %v341_v32  ;;  %v311_v46 = vsub.f32 %v309_v41, %v310_v44  ;;  %v318_v49 = vand.u32 4294901760, %v317_v47  ;;  %v1458_v58 = vand.u32 4294901760, %v637_v57  ;;  %v1472_v62 = vand.u32 4294901760, %v636_v60  ;;  %v632_v20 = vld [vmem:[%s1670_s3 + $0x10] sm:$0xff] }
  0x35   : > { %v296_v36 = vand.u32 4294901760, %v295_v33  ;;  %401 = vmatpush.msra.mxu2 %v356_v17  ;;  %446 = vmatmul.f32.vlgmr.msra.gmra.mxu3 %v294_v27  ;;  %v304_v43 = vand.u32 4294901760, %v303_v40  ;;  %v1501_v10 = vand.u32 4294901760, %v634_v6  ;;  %v1519_v19 = vand.u32 4294901760, %v633_v12  ;;  %p1215_p13 = pneg %p1214_p12 }
  0x36   : > { %404 = vmatmul.f32.vlgmr.msra.gmra.mxu2 %v293_v21  ;;  %348 = vmatpush.msra.mxu1 %v347_v34  ;;  %v312_v48 = vand.u32 4294901760, %v311_v46  ;;  %v319_v50 = vsub.f32 %v317_v47, %v318_v49  ;;  %v1470_v61 = vsub.f32 %v637_v57, %v1458_v58  ;;  %v1544_v30 = vand.u32 4294901760, %v631_v26 }
  0x37   : > { %297 = vmatmul.f32.vlgmr.msra.gmra.mxu0 %v296_v36  ;;  %664 = vmatpush.msrb.mxu2 %v1458_v58  ;;  %p1220_p4 = pnand %p1219_p3, %p1215_p13 }
  0x38   : > { %487 = vmatpush.msrb.mxu0 %v345_v22  ;;  %354 = vmatpush.msra.mxu1 %v353_v37  ;;  %v320_v51 = vand.u32 4294901760, %v319_v50  ;;  %v722_v2 = vand.u32 4294901760, %v1470_v61  ;;  %v757_v38 = vsub.f32 %v631_v26, %v1544_v30 }
  0x39   : > { %666 = vmatpush.msrb.mxu2 %v1472_v62 }
  0x3a   : > { %491 = vmatpush.msrb.mxu0 %v351_v23  ;;  %360 = vmatpush.msra.mxu1 %v359_v39  ;;  %v723_v7 = vsub.f32 %v1470_v61, %v722_v2  ;;  %v1528_v23 = vand.u32 4294901760, %v632_v20 }
  0x3b   : > { %362 = vmatmul.f32.vlgmr.msra.gmra.mxu1 %v1425_v16 }
  0x3c   : > { %495 = vmatpush.msrb.mxu0 %v357_v24  ;;  %526 = vmatpush.msrb.mxu1 %v1404_v3  ;;  %v1483_v3 = vsub.f32 %v636_v60, %v1472_v62  ;;  %v724_v14 = vand.u32 4294901760, %v723_v7  ;;  %v1542_v29 = vsub.f32 %v632_v20, %v1528_v23 }
  0x3d   : > { %452 = vmatmul.f32.gmra.mxu3 %v302_v35  ;;  %v630_v35 = vld [vmem:[%s1670_s3] sm:$0xff] }
  0x3e   : > { %409 = vmatmul.f32.gmra.mxu2 %v301_v25  ;;  %528 = vmatpush.msrb.mxu1 %v1406_v4  ;;  %v1485_v4 = vand.u32 4294901760, %v635_v63  ;;  %v728_v8 = vand.u32 4294901760, %v1483_v3  ;;  %v1533_v25 = vsub.f32 %v633_v12, %v1519_v19  ;;  %v752_v37 = vand.u32 4294901760, %v1542_v29 }
  0x3f   : > { %305 = vmatmul.f32.gmra.mxu0 %v304_v43  ;;  %725 = vmatpush.msrb.mxu3 %v724_v14  ;;  %v1559_v39 = vand.u32 4294901760, %v630_v35 }
  0x40   : > { %530 = vmatpush.msrb.mxu1 %v1408_v5  ;;  %795 = vmatpush.msra.mxu0 %v1470_v61  ;;  %v729_v15 = vsub.f32 %v1483_v3, %v728_v8  ;;  %v746_v34 = vand.u32 4294901760, %v1533_v25  ;;  %v753_v43 = vsub.f32 %v1542_v29, %v752_v37 }
  0x41   : > { %668 = vmatpush.msrb.mxu2 %v1485_v4 }
  0x42   : > { %532 = vmatpush.msrb.mxu1 %v1415_v9  ;;  %v1499_v9 = vsub.f32 %v635_v63, %v1485_v4  ;;  %798 = vmatpush.msra.mxu0 %v1483_v3  ;;  %v730_v21 = vand.u32 4294901760, %v729_v15  ;;  %v747_v42 = vsub.f32 %v1533_v25, %v746_v34  ;;  %v754_v50 = vand.u32 4294901760, %v753_v43 }
  0x43   : > { %366 = vmatmul.f32.gmra.mxu1 %v1428_v18  ;;  %670 = vmatpush.msrb.mxu2 %v1501_v10 }
  0x44   : > { %847 = vmatpush.msra.mxu1 %v1458_v58  ;;  %801 = vmatpush.msra.mxu0 %v1499_v9 }
  0x45   : > { %458 = vmatmul.f32.gmra.mxu3 %v310_v44  ;;  %672 = vmatpush.msrb.mxu2 %v1519_v19  ;;  %v758_v44 = vand.u32 4294901760, %v757_v38 }
  0x46   : > { %414 = vmatmul.f32.gmra.mxu2 %v309_v41  ;;  %849 = vmatpush.msra.mxu1 %v1472_v62 }
  0x47   : > { %313 = vmatmul.f32.gmra.mxu0 %v312_v48  ;;  %731 = vmatpush.msrb.mxu3 %v730_v21  ;;  %v748_v48 = vand.u32 4294901760, %v747_v42 }
  0x48   : > { %851 = vmatpush.msra.mxu1 %v1485_v4  ;;  %674 = vmatpush.msrb.mxu2 %v1528_v23 }
  0x4a   : > { %853 = vmatpush.msra.mxu1 %v1501_v10  ;;  %676 = vmatpush.msrb.mxu2 %v1544_v30 }
  0x4b   : > { %370 = vmatmul.f32.gmra.mxu1 %v308_v31 }
  0x4c   : > { %855 = vmatpush.msra.mxu1 %v1519_v19  ;;  %678 = vmatpush.msrb.mxu2 %v1559_v39 }
  0x4d   : > { %464 = vmatmul.f32.gmra.mxu3 %v318_v49 }
  0x4e   : > { %419 = vmatmul.f32.gmra.mxu2 %v317_v47  ;;  %857 = vmatpush.msra.mxu1 %v1528_v23 }
  0x4f   : > { %321 = vmatmul.f32.gmra.mxu0 %v320_v51  ;;  %v759_v51 = vsub.f32 %v757_v38, %v758_v44  ;;  %898 = vmatpush.msra.mxu2 %v722_v2 }
  0x50   : > { %859 = vmatpush.msra.mxu1 %v1544_v30 }
  0x51   : > { %v760_v57 = vand.u32 4294901760, %v759_v51  ;;  %902 = vmatpush.msra.mxu2 %v728_v8 }
  0x52   : > { %861 = vmatpush.msra.mxu1 %v1559_v39 }
  0x53   : > { %374 = vmatmul.f32.gmra.mxu1 %v316_v45 }
  0x57   : > { %497 = vmatmul.f32.vlgmr.msrb.gmra.mxu0 %v1425_v16 }
  0x5b   : > { %534 = vmatmul.f32.vlgmr.msrb.gmra.mxu1 %v1425_v16  ;;  %v734_v16 = vand.u32 4294901760, %v1499_v9 }
  0x5d   : > { %v735_v22 = vsub.f32 %v1499_v9, %v734_v16  ;;  %906 = vmatpush.msra.mxu2 %v734_v16 }
  0x5f   : > { %501 = vmatmul.f32.gmra.mxu0 %v1428_v18  ;;  %v736_v28 = vand.u32 4294901760, %v735_v22 }
  0x61   : > { %737 = vmatpush.msrb.mxu3 %v736_v28 }
  0x63   : > { %538 = vmatmul.f32.gmra.mxu1 %v1428_v18  ;;  %v1517_v18 = vsub.f32 %v634_v6, %v1501_v10 }
  0x65   : > { %v740_v24 = vand.u32 4294901760, %v1517_v18  ;;  %804 = vmatpush.msra.mxu0 %v1517_v18 }
  0x67   : > { %505 = vmatmul.f32.gmra.mxu0 %v308_v31  ;;  %v741_v33 = vsub.f32 %v1517_v18, %v740_v24  ;;  %910 = vmatpush.msra.mxu2 %v740_v24 }
  0x68   : > { %807 = vmatpush.msra.mxu0 %v1533_v25 }
  0x69   : > { %v742_v41 = vand.u32 4294901760, %v741_v33  ;;  %914 = vmatpush.msra.mxu2 %v746_v34 }
  0x6a   : > { %810 = vmatpush.msra.mxu0 %v1542_v29 }
  0x6b   : > { %542 = vmatmul.f32.gmra.mxu1 %v308_v31  ;;  %743 = vmatpush.msrb.mxu3 %v742_v41 }
  0x6c   : > { %813 = vmatpush.msra.mxu0 %v757_v38  ;;  %918 = vmatpush.msra.mxu2 %v752_v37 }
  0x6d   : > { %749 = vmatpush.msrb.mxu3 %v748_v48 }
  0x6e   : > { %922 = vmatpush.msra.mxu2 %v758_v44 }
  0x6f   : > { %509 = vmatmul.f32.gmra.mxu0 %v316_v45  ;;  %755 = vmatpush.msrb.mxu3 %v754_v50 }
  0x71   : > { %761 = vmatpush.msrb.mxu3 %v760_v57 }
  0x73   : > { %546 = vmatmul.f32.gmra.mxu1 %v316_v45  ;;  %v763_v45 = vsub.f32 %v630_v35, %v1559_v39 }
  0x75   : > { %816 = vmatpush.msra.mxu0 %v763_v45 }
  0xb4   : > { %v298_v52 = vpop.f32.mrf.mxu0 }
  0xb5   : > { %v299_v5 = vadd.f32 %v1463_v59, %v298_v52  ;;  %v764_v52 = vand.u32 4294901760, %v763_v45 }
  0xb7   : > { %v765_v60 = vsub.f32 %v763_v45, %v764_v52  ;;  %926 = vmatpush.msra.mxu2 %v764_v52 }
  0xb8   : > { %v363_v53 = vpop.f32.mrf.mxu1  ;;  %v447_v13 = vpop.f32.mrf.mxu3 }
  0xb9   : > { %v405_v0 = vpop.f32.mrf.mxu2  ;;  %v364_v17 = vadd.f32 %v363_v53, %v299_v5  ;;  %v766_v5 = vand.u32 4294901760, %v765_v60 }
  0xbb   : > { %v406_v32 = vadd.f32 %v405_v0, %v364_v17  ;;  %767 = vmatpush.msrb.mxu3 %v766_v5 }
  0xbc   : > { %v306_v54 = vpop.f32.mrf.mxu0 }
  0xbd   : > { %v307_v31 = vadd.f32 %v1463_v59, %v306_v54  ;;  %v448_v46 = vadd.f32 %v447_v13, %v406_v32  ;;  %953 = vmatpush.msra.mxu3 %v1458_v58 }
  0xbf   : > { %955 = vmatpush.msra.mxu3 %v1472_v62 }
  0xc0   : > { %v1451_v55 = vpop.f32.mrf.mxu1  ;;  %v453_v49 = vpop.f32.mrf.mxu3 }
  0xc1   : > { %v410_v36 = vpop.f32.mrf.mxu2  ;;  %v368_v47 = vadd.f32 %v1451_v55, %v307_v31  ;;  %957 = vmatpush.msra.mxu3 %v1485_v4 }
  0xc3   : > { %v411_v63 = vadd.f32 %v410_v36, %v368_v47  ;;  %959 = vmatpush.msra.mxu3 %v1501_v10 }
  0xc4   : > { %v1453_v56 = vpop.f32.mrf.mxu0 }
  0xc5   : > { %v315_v55 = vadd.f32 %v1463_v59, %v1453_v56  ;;  %v454_v61 = vadd.f32 %v453_v49, %v411_v63  ;;  %961 = vmatpush.msra.mxu3 %v1519_v19 }
  0xc7   : > { %963 = vmatpush.msra.mxu3 %v1528_v23 }
  0xc8   : > { %v1478_v1 = vpop.f32.mrf.mxu1  ;;  %v459_v3 = vpop.f32.mrf.mxu3 }
  0xc9   : > { %v415_v12 = vpop.f32.mrf.mxu2  ;;  %v372_v2 = vadd.f32 %v1478_v1, %v315_v55  ;;  %965 = vmatpush.msra.mxu3 %v1544_v30 }
  0xcb   : > { %v416_v13 = vadd.f32 %v415_v12, %v372_v2  ;;  %967 = vmatpush.msra.mxu3 %v1559_v39 }
  0xcc   : > { %v1504_v11 = vpop.f32.mrf.mxu0 }
  0xcd   : > { %v323_v9 = vadd.f32 %v1463_v59, %v1504_v11  ;;  %v460_v17 = vadd.f32 %v459_v3, %v416_v13 }
  0xd0   : > { %v1539_v27 = vpop.f32.mrf.mxu1  ;;  %v465_v21 = vpop.f32.mrf.mxu3 }
  0xd1   : > { %v376_v62 = vadd.f32 %v1539_v27, %v323_v9  ;;  %v420_v18 = vpop.f32.mrf.mxu2 }
  0xd3   : > { %v421_v11 = vadd.f32 %v420_v18, %v376_v62 }
  0xd4   : > { %v498_v40 = vpop.f32.mrf.mxu0 }
  0xd5   : > { %v499_v53 = vadd.f32 %v498_v40, %v448_v46  ;;  %v466_v19 = vadd.f32 %v465_v21, %v421_v11 }
  0xd8   : > { %v535_v54 = vpop.f32.mrf.mxu1 }
  0xd9   : > { %v1575_v0 = vadd.f32 %v535_v54, %v499_v53 }
  0xdb   : > { %v1087_v6 = vmul.f32 -1.442695, %v1575_v0 }
  0xdc   : > { %v502_v7 = vpop.f32.mrf.mxu0 }
  0xdd   : > { %1150 = vpow2.f32 %v1087_v6  ;;  %v503_v56 = vadd.f32 %v502_v7, %v454_v61 }
  0xe0   : > { %v539_v8 = vpop.f32.mrf.mxu1 }
  0xe1   : > { %v1589_v14 = vadd.f32 %v539_v8, %v503_v56 }
  0xe3   : > { %v1151_v1 = vpop.eup %1150  ;;  %v1088_v58 = vmul.f32 -1.442695, %v1589_v14 }
  0xe4   : > { %v506_v15 = vpop.f32.mrf.mxu0  ;;  %v562_v16 = vadd.f32 1.0, %v1151_v1 }
  0xe5   : > { %1152 = vpow2.f32 %v1088_v58  ;;  %v507_v59 = vadd.f32 %v506_v15, %v460_v17 }
  0xe6   : > { %1154 = vrcp.f32 %v562_v16  ;;  %v577_v29 = vand.u32 2147483648, %v562_v16  ;;  %v575_v33 = vand.u32 2147483647, %v562_v16  ;;  %vm571_vm2 = vweird.f32 %v562_v16 }
  0xe8   : > { %v543_v4 = vpop.f32.mrf.mxu1  ;;  %v578_v38 = vor.u32 1.1754944e-38, %v577_v29  ;;  %vm576_vm4 = vcmp.eq.f32.partialorder %v575_v33, 8.507059e+37 }
  0xe9   : > { %v1597_v20 = vadd.f32 %v543_v4, %v507_v59 }
  0xeb   : > { %v1153_v10 = vpop.eup %1152  ;;  %v1089_v22 = vmul.f32 -1.442695, %v1597_v20 }
  0xec   : > { %v1155_v24 = vpop.eup %1154  ;;  %v563_v25 = vadd.f32 1.0, %v1153_v10  ;;  %v510_v26 = vpop.f32.mrf.mxu0 }
  0xed   : > { %v567_v27 = vmul.f32 %v1155_v24, %v562_v16  ;;  %1156 = vpow2.f32 %v1089_v22  ;;  %v511_v23 = vadd.f32 %v510_v26, %v466_v19  ;;  %vm572_vm1 = vweird.f32 %v1155_v24 }
  0xee   : > { %1158 = vrcp.f32 %v563_v25  ;;  %vm573_vm3 = vmor %vm571_vm2, %vm572_vm1  ;;  %v592_v45 = vand.u32 2147483648, %v563_v25  ;;  %v590_v48 = vand.u32 2147483647, %v563_v25  ;;  %vm586_vm7 = vweird.f32 %v563_v25 }
  0xef   : > { %v568_v28 = vsub.f32 1.0, %v567_v27 }
  0xf0   : > { %v547_v31 = vpop.f32.mrf.mxu1  ;;  %v593_v54 = vor.u32 1.1754944e-38, %v592_v45  ;;  %vm591_vm9 = vcmp.eq.f32.partialorder %v590_v48, 8.507059e+37 }
  0xf1   : > { %v569_v32 = vmul.f32 %v1155_v24, %v568_v28  ;;  %v1602_v30 = vadd.f32 %v547_v31, %v511_v23 }
  0xf3   : > { %v1157_v34 = vpop.eup %1156  ;;  %v570_v35 = vadd.f32 %v1155_v24, %v569_v32  ;;  %v1090_v36 = vmul.f32 -1.442695, %v1602_v30 }
  0xf4   : > { %v1159_v37 = vpop.eup %1158  ;;  %v564_v39 = vadd.f32 1.0, %v1157_v34 }
  0xf5   : > { %v574_v40 = vsel %vm573_vm3, %v1155_v24, %v570_v35  ;;  %v582_v41 = vmul.f32 %v1159_v37, %v563_v25  ;;  %1160 = vpow2.f32 %v1090_v36  ;;  %vm587_vm6 = vweird.f32 %v1159_v37 }
  0xf6   : > { %v579_v42 = vsel %vm576_vm4, %v578_v38, %v574_v40  ;;  %1162 = vrcp.f32 %v564_v39  ;;  %vm588_vm8 = vmor %vm586_vm7, %vm587_vm6  ;;  %v605_v7 = vand.u32 2147483647, %v564_v39  ;;  %v607_v12 = vand.u32 2147483648, %v564_v39 }
  0xf7   : > { %v626_v43 = vmul.f32 %v579_v42, %v1575_v0  ;;  %v583_v44 = vsub.f32 1.0, %v582_v41  ;;  %vm601_vm11 = vweird.f32 %v564_v39  ;;  %v1149_v42 = vld [vmem:[%s1671_s4] ss:$0 sm:$0xff] }
  0xf8   : > { %v608_v1 = vor.u32 1.1754944e-38, %v607_v12  ;;  %vm606_vm13 = vcmp.eq.f32.partialorder %v605_v7, 8.507059e+37 }
  0xf9   : > { %v644_v46 = vsel %vm642_vm5, %v626_v43, 0  ;;  %v584_v47 = vmul.f32 %v1159_v37, %v583_v44 }
  0xfa   : > { %v1607_v49 = vand.u32 4294901760, %v644_v46 }
  0xfb   : > { %v1161_v50 = vpop.eup %1160  ;;  %v585_v51 = vadd.f32 %v1159_v37, %v584_v47 }
  0xfc   : > { %v1163_v52 = vpop.eup %1162  ;;  %v680_v53 = vsub.f32 %v644_v46, %v1607_v49  ;;  %v565_v57 = vadd.f32 1.0, %v1161_v50  ;;  %769 = vmatmul.f32.vlgmr.msrb.gmra.mxu3 %v1607_v49 }
  0xfd   : > { %v589_v60 = vsel %vm588_vm8, %v1159_v37, %v585_v51  ;;  %v597_v55 = vmul.f32 %v1163_v52, %v564_v39  ;;  %vm602_vm10 = vweird.f32 %v1163_v52 }
  0xfe   : > { %v594_v63 = vsel %vm591_vm9, %v593_v54, %v589_v60  ;;  %1164 = vrcp.f32 %v565_v57  ;;  %819 = vmatmul.f32.vlgmr.msra.gmra.mxu0 %v680_v53  ;;  %v681_v6 = vand.u32 4294901760, %v680_v53  ;;  %vm603_vm12 = vmor %vm601_vm11, %vm602_vm10  ;;  %v622_v59 = vand.u32 2147483648, %v565_v57 }
  0xff   : > { %v627_v0 = vmul.f32 %v594_v63, %v1589_v14  ;;  %v598_v5 = vsub.f32 1.0, %v597_v55  ;;  %v620_v10 = vand.u32 2147483647, %v565_v57  ;;  %vm616_vm15 = vweird.f32 %v565_v57 }
 0x100   : > { %865 = vmatmul.f32.vlgmr.msra.gmra.mxu1 %v681_v6  ;;  %v682_v56 = vsub.f32 %v680_v53, %v681_v6  ;;  %v623_v26 = vor.u32 1.1754944e-38, %v622_v59 }
 0x101   : > { %v647_v61 = vsel %vm642_vm5, %v627_v0, 0  ;;  %v599_v2 = vmul.f32 %v1163_v52, %v598_v5  ;;  %vm621_vm2 = vcmp.eq.f32.partialorder %v620_v10, 8.507059e+37 }
 0x102   : > { %v687_v3 = vand.u32 4294901760, %v647_v61  ;;  %v683_v9 = vand.u32 4294901760, %v682_v56 }
 0x103   : > { %v600_v8 = vadd.f32 %v1163_v52, %v599_v2 }
 0x104   : > { %v1165_v13 = vpop.eup %1164  ;;  %773 = vmatmul.f32.gmra.mxu3 %v687_v3  ;;  %v688_v58 = vsub.f32 %v647_v61, %v687_v3  ;;  %684 = vmatmul.f32.vlgmr.msrb.gmra.mxu2 %v683_v9 }
 0x105   : > { %v604_v14 = vsel %vm603_vm12, %v1163_v52, %v600_v8  ;;  %v612_v15 = vmul.f32 %v1165_v13, %v565_v57  ;;  %vm617_vm14 = vweird.f32 %v1165_v13 }
 0x106   : > { %v609_v16 = vsel %vm606_vm13, %v608_v1, %v604_v14  ;;  %824 = vmatmul.f32.gmra.mxu0 %v688_v58  ;;  %v689_v17 = vand.u32 4294901760, %v688_v58  ;;  %vm618_vm1 = vmor %vm616_vm15, %vm617_vm14 }
 0x107   : > { %v628_v62 = vmul.f32 %v609_v16, %v1597_v20  ;;  %v613_v18 = vsub.f32 1.0, %v612_v15 }
 0x108   : > { %v690_v4 = vsub.f32 %v688_v58, %v689_v17  ;;  %871 = vmatmul.f32.gmra.mxu1 %v689_v17 }
 0x109   : > { %v650_v11 = vsel %vm642_vm5, %v628_v62, 0  ;;  %v614_v21 = vmul.f32 %v1165_v13, %v613_v18 }
 0x10a   : > { %v695_v22 = vand.u32 4294901760, %v650_v11  ;;  %v691_v24 = vand.u32 4294901760, %v690_v4 }
 0x10b   : > { %v615_v25 = vadd.f32 %v1165_v13, %v614_v21 }
 0x10c   : > { %777 = vmatmul.f32.gmra.mxu3 %v695_v22  ;;  %v696_v19 = vsub.f32 %v650_v11, %v695_v22  ;;  %692 = vmatmul.f32.gmra.mxu2 %v691_v24 }
 0x10d   : > { %v619_v27 = vsel %vm618_vm1, %v1165_v13, %v615_v25 }
 0x10e   : > { %v624_v20 = vsel %vm621_vm2, %v623_v26, %v619_v27  ;;  %829 = vmatmul.f32.gmra.mxu0 %v696_v19  ;;  %v697_v28 = vand.u32 4294901760, %v696_v19 }
 0x10f   : > { %v629_v23 = vmul.f32 %v624_v20, %v1602_v30 }
 0x110   : > { %v698_v29 = vsub.f32 %v696_v19, %v697_v28  ;;  %877 = vmatmul.f32.gmra.mxu1 %v697_v28 }
 0x111   : > { %v653_v31 = vsel %vm642_vm5, %v629_v23, 0 }
 0x112   : > { %v703_v32 = vand.u32 4294901760, %v653_v31  ;;  %v699_v33 = vand.u32 4294901760, %v698_v29 }
 0x114   : > { %781 = vmatmul.f32.gmra.mxu3 %v703_v32  ;;  %v704_v34 = vsub.f32 %v653_v31, %v703_v32  ;;  %700 = vmatmul.f32.gmra.mxu2 %v699_v33 }
 0x116   : > { %834 = vmatmul.f32.gmra.mxu0 %v704_v34  ;;  %v705_v35 = vand.u32 4294901760, %v704_v34 }
 0x118   : > { %v706_v36 = vsub.f32 %v704_v34, %v705_v35  ;;  %883 = vmatmul.f32.gmra.mxu1 %v705_v35 }
 0x11a   : > { %v707_v37 = vand.u32 4294901760, %v706_v36 }
 0x11c   : > { %969 = vmatmul.f32.vlgmr.msra.gmra.mxu3 %v1607_v49  ;;  %708 = vmatmul.f32.gmra.mxu2 %v707_v37 }
 0x124   : > { %973 = vmatmul.f32.gmra.mxu3 %v687_v3  ;;  %928 = vmatmul.f32.vlgmr.msra.gmra.mxu2 %v1607_v49 }
 0x12c   : > { %977 = vmatmul.f32.gmra.mxu3 %v695_v22  ;;  %932 = vmatmul.f32.gmra.mxu2 %v687_v3 }
 0x134   : > { %981 = vmatmul.f32.gmra.mxu3 %v703_v32  ;;  %936 = vmatmul.f32.gmra.mxu2 %v695_v22 }
 0x13c   : > { %940 = vmatmul.f32.gmra.mxu2 %v703_v32 }
 0x17b   : > { %v820_v46 = vpop.f32.mrf.mxu0 }
 0x17d   : > { %v866_v48 = vpop.f32.mrf.mxu1 }
 0x17f   : > { %v770_v30 = vpop.f32.mrf.mxu3 }
 0x183   : > { %v825_v53 = vpop.f32.mrf.mxu0 }
 0x185   : > { %v872_v63 = vpop.f32.mrf.mxu1 }
 0x187   : > { %v774_v38 = vpop.f32.mrf.mxu3  ;;  %v685_v39 = vpop.f32.mrf.mxu2 }
 0x188   : > { %v686_v45 = vadd.f32 %v1149_v42, %v685_v39 }
 0x18a   : > { %v771_v47 = vadd.f32 %v770_v30, %v686_v45 }
 0x18b   : > { %v830_v2 = vpop.f32.mrf.mxu0 }
 0x18c   : > { %v821_v51 = vadd.f32 %v820_v46, %v771_v47 }
 0x18d   : > { %v878_v1 = vpop.f32.mrf.mxu1 }
 0x18e   : > { %v867_v57 = vadd.f32 %v866_v48, %v821_v51 }
 0x18f   : > { %v693_v40 = vpop.f32.mrf.mxu2  ;;  %v778_v41 = vpop.f32.mrf.mxu3 }
 0x190   : > { %v694_v50 = vadd.f32 %v1149_v42, %v693_v40 }
 0x192   : > { %v775_v54 = vadd.f32 %v774_v38, %v694_v50 }
 0x193   : > { %v835_v62 = vpop.f32.mrf.mxu0 }
 0x194   : > { %v826_v6 = vadd.f32 %v825_v53, %v775_v54 }
 0x195   : > { %v884_v4 = vpop.f32.mrf.mxu1 }
 0x196   : > { %v873_v61 = vadd.f32 %v872_v63, %v826_v6 }
 0x197   : > { %v701_v43 = vpop.f32.mrf.mxu2  ;;  %v782_v44 = vpop.f32.mrf.mxu3 }
 0x198   : > { %v702_v0 = vadd.f32 %v1149_v42, %v701_v43 }
 0x19a   : > { %v779_v12 = vadd.f32 %v778_v41, %v702_v0 }
 0x19c   : > { %v831_v13 = vadd.f32 %v830_v2, %v779_v12 }
 0x19e   : > { %v879_v14 = vadd.f32 %v878_v1, %v831_v13 }
 0x19f   : > { %v709_v49 = vpop.f32.mrf.mxu2  ;;  %v970_v52 = vpop.f32.mrf.mxu3 }
 0x1a0   : > { %v710_v8 = vadd.f32 %v1149_v42, %v709_v49 }
 0x1a2   : > { %v783_v58 = vadd.f32 %v782_v44, %v710_v8 }
 0x1a4   : > { %v836_v59 = vadd.f32 %v835_v62, %v783_v58 }
 0x1a6   : > { %v885_v11 = vadd.f32 %v884_v4, %v836_v59 }
 0x1a7   : > { %v929_v60 = vpop.f32.mrf.mxu2  ;;  %v974_v7 = vpop.f32.mrf.mxu3 }
 0x1a8   : > { %v930_v55 = vadd.f32 %v929_v60, %v867_v57 }
 0x1aa   : > { %v971_v5 = vadd.f32 %v970_v52, %v930_v55 }
 0x1ac   : > { %985 = vst.msk [vmem:[%s1624_s13] sm:$0xff] %vm259_vm0, %v971_v5 }
 0x1af   : > { %v933_v56 = vpop.f32.mrf.mxu2  ;;  %v978_v15 = vpop.f32.mrf.mxu3 }
 0x1b0   : > { %v934_v3 = vadd.f32 %v933_v56, %v873_v61 }
 0x1b2   : > { %v975_v9 = vadd.f32 %v974_v7, %v934_v3 }
 0x1b4   : > { %986 = vst.msk [vmem:[%s1624_s13 + $0x8] sm:$0xff] %vm259_vm0, %v975_v9 }
 0x1b7   : > { %v937_v16 = vpop.f32.mrf.mxu2  ;;  %v982_v22 = vpop.f32.mrf.mxu3 }
 0x1b8   : > { %v938_v17 = vadd.f32 %v937_v16, %v879_v14 }
 0x1ba   : > { %v979_v18 = vadd.f32 %v978_v15, %v938_v17 }
 0x1bc   : > { %987 = vst.msk [vmem:[%s1624_s13 + $0x10] sm:$0xff] %vm259_vm0, %v979_v18 }
 0x1bf   : > { %v941_v21 = vpop.f32.mrf.mxu2 }
 0x1c0   : > { %v942_v10 = vadd.f32 %v941_v21, %v885_v11 }
 0x1c2   : > { %v983_v24 = vadd.f32 %v982_v22, %v942_v10 }
 0x1c4   : > { %988 = vst.msk [vmem:[%s1624_s13 + $0x18] sm:$0xff] %vm259_vm0, %v983_v24 }
 0x1c5   : > { %1223 = shalt.err (!%p1220_p4)
}
 0x1c6   : > { %s1266_s12 = smov 128   ;;  %s1267_s25 = smov 8  }
 0x1c7   : > { %1100 = dma.vmem_to_hbm [thread:$0]  (%p1347_p10), %s1003_s26, 512, %s1005_s8, %s990_s22, %s1266_s12, %s1266_s12, %s1267_s25  }
 0x1c8 PF: > { %p1111_p5 = scmp.ge.s32.totalorder %s1262_s21, 2  ;;  %s1019_s13 = sand.u32 1, %s1250_s18  }
 0x1c9   : > { %s1020_s14 = scalar_lea.sflag [#allocation4], %s1019_s13 }
 0x1ca   : > { %p1107_p7 = pnand %p1111_p5, %p1351_p11 }
 0x1cc   : > { %p1108_p8 = pneg %p1107_p7 }
 0x1ce   : > { %1245 = dma.done.wait (%p1108_p8), %s1020_s14, 512  }
 0x1cf   : > { %1247 = vsyncadd (%p1108_p8), %s1020_s14, 4294966784  ;;  %p18_p9 = scmp.ge.s32.totalorder %s1323_s24, 6   ;;  %s1678_s18 = smov %s1254_s19 }
 0x1d0   : > { %s1679_s19 = smov %s1258_s20  ;;  %s1680_s20 = smov %s1335_s27 }
 0x1d1   : > { %s1681_s21 = smov %s1323_s24  ;;  %20 = sbr.rel (!%p18_p9) target bundleno = 5 (0x5), region = 85 }
 0x1d6   :  { %1026 = vsyncpa [#allocation3], 1 }
 0x1d7   :  { %1028 = vsyncpa [#allocation3 + $0x1], 1 }
 0x1d8   :  { %1029 = vsyncpa [#allocation4], 1 }
 0x1d9   :  { %1031 = vsyncpa [#allocation4 + $0x1], 1 }

</bundles_post_ra>
